<compile_context>
chip_gen: v6e
topology: v6e:2x2x1
jax: 0.10.0
libtpu: 0.0.40
codegen_flags: <defaults>
</compile_context>

<pallas_src>
import jax
import jax.numpy as jnp
from jax.experimental import pallas as pl
from jax.experimental.pallas import tpu as pltpu

LAYERS = [1, 3, 2, 1]

_SUBLANES = 8
_LANES = 128
_E_MIN = _SUBLANES * _LANES        # 1024 batch elements: smallest legal dense tile
_E_MAX = _SUBLANES * 16384         # 128K elements/step -> ~7.3 MiB double-buffered

# Flat parameter layout (f32[17], SMEM):
#   [0:3]   w1 (1,3)          [3:6]   b1 (3,)
#   [6:12]  w2 (3,2) row-major [12:14] b2 (2,)
#   [14:16] w3 (2,1)           [16]    b3 (1,)


def _cdiv(a, b):
    return -(-a // b)


def _round_up(n, m):
    return ((n + m - 1) // m) * m


def _pick_tile(B):
    """Batch elements per grid step: multiple of 1024, <=128K, >=2 even steps
    when the batch is big enough, and chosen from B so over-padding stays small."""
    b_ceil = _round_up(max(B, 1), _E_MIN)
    if b_ceil <= 2 * _E_MIN:
        return b_ceil                       # tiny batch: single step
    steps = max(2, _cdiv(b_ceil, _E_MAX))
    if steps % 2:                           # even step count -> clean megacore split
        steps += 1
    e = _round_up(_cdiv(b_ceil, steps), _E_MIN)
    return min(e, _E_MAX)


def _compute_mlp(p_ref, x):
    """Shared VPU/EUP math on a dense (8, TBL) batch slab."""
    # layer 0: Linear(1, 3) + tanh  -- scalar-broadcast FMA (VPU), tanh (EUP)
    h1_0 = jnp.tanh(p_ref[0] * x + p_ref[3])
    h1_1 = jnp.tanh(p_ref[1] * x + p_ref[4])
    h1_2 = jnp.tanh(p_ref[2] * x + p_ref[5])
    # layer 1: Linear(3, 2) + tanh   (w2 row-major: w2[i, j] at 6 + 2*i + j)
    h2_0 = jnp.tanh(h1_0 * p_ref[6] + h1_1 * p_ref[8] + h1_2 * p_ref[10] + p_ref[12])
    h2_1 = jnp.tanh(h1_0 * p_ref[7] + h1_1 * p_ref[9] + h1_2 * p_ref[11] + p_ref[13])
    # layer 2 (last): Linear(2, 1), no activation
    y = h2_0 * p_ref[14] + h2_1 * p_ref[15] + p_ref[16]
    return h1_0, h1_1, h1_2, h2_0, h2_1, y


def _mlp_full_kernel(p_ref, x_ref, out_ref):
    x = x_ref[...]                                     # (8, TBL) f32, dense vregs
    h1_0, h1_1, h1_2, h2_0, h2_1, y = _compute_mlp(p_ref, x)
    # Direct per-feature row stores into the (6, 8, TBL) block: plain vst's,
    # no sublane concatenate / relayout, no pad rows.
    out_ref[0, :, :] = h1_0
    out_ref[1, :, :] = h1_1
    out_ref[2, :, :] = h1_2
    out_ref[3, :, :] = h2_0
    out_ref[4, :, :] = h2_1
    out_ref[5, :, :] = y


def _mlp_y_kernel(p_ref, x_ref, out_ref):
    x = x_ref[...]                                     # (8, TBL)
    _, _, _, _, _, y = _compute_mlp(p_ref, x)
    out_ref[...] = y                                   # y-only fast path


def _flat_params(params):
    return jnp.concatenate([
        params["w1"].reshape(-1), params["b1"].reshape(-1),
        params["w2"].reshape(-1), params["b2"].reshape(-1),
        params["w3"].reshape(-1), params["b3"].reshape(-1),
    ]).astype(jnp.float32)


def my_ann_forward(x, params, *, return_activations=True, unpack=True):
    """Pallas equivalent of MyANN.forward.

    x: (B, 1) float32
    params: dict with w1 (1,3), b1 (1,3), w2 (3,2), b2 (1,2), w3 (2,1), b3 (1,1)
            (weights stored as (in, out): y = x @ W + b, matching PyTorch
             nn.Linear's x @ W.T + b with W of shape (out, in)).

    return_activations=True, unpack=True  -> (x_array, y) exactly like PyTorch.
    return_activations=True, unpack=False -> (fused (6, B_pad) feature-major
        array [h1(3); h2(2); y(1)], y (1, B) view) with no wrapper transposes.
    return_activations=False              -> y (B, 1) only (minimal HBM writes).
    """
    B = x.shape[0]
    x = x.astype(jnp.float32)

    E = _pick_tile(B)                  # batch elements per grid step
    B_pad = _round_up(B, E)
    steps = B_pad // E
    TBL = E // _SUBLANES               # lanes per step (multiple of 128)

    # Batch -> dense (8, B_pad/8) slab (contiguous reshape: no extra HBM pass
    # beyond the one zero-pad/set).  Every vreg in the kernel is fully live.
    x_flat = jnp.zeros((B_pad,), jnp.float32).at[:B].set(x[:, 0])
    x_dense = x_flat.reshape(_SUBLANES, B_pad // _SUBLANES)

    p = _flat_params(params)
    cparams = pltpu.CompilerParams(dimension_semantics=("parallel",))

    if not return_activations:
        y_dense = pl.pallas_call(
            _mlp_y_kernel,
            out_shape=jax.ShapeDtypeStruct((_SUBLANES, B_pad // _SUBLANES),
                                           jnp.float32),
            grid=(steps,),
            in_specs=[
                pl.BlockSpec(memory_space=pltpu.MemorySpace.SMEM),   # f32[17]
                pl.BlockSpec((_SUBLANES, TBL), lambda i: (0, i)),    # x tile
            ],
            out_specs=pl.BlockSpec((_SUBLANES, TBL), lambda i: (0, i)),
            compiler_params=cparams,
        )(p, x_dense)
        return y_dense.reshape(B_pad)[:B, None]                      # (B, 1)

    fused = pl.pallas_call(
        _mlp_full_kernel,
        out_shape=jax.ShapeDtypeStruct((6, _SUBLANES, B_pad // _SUBLANES),
                                       jnp.float32),
        grid=(steps,),
        in_specs=[
            pl.BlockSpec(memory_space=pltpu.MemorySpace.SMEM),       # f32[17]
            pl.BlockSpec((_SUBLANES, TBL), lambda i: (0, i)),        # x tile
        ],
        out_specs=pl.BlockSpec((6, _SUBLANES, TBL), lambda i: (0, 0, i)),
        compiler_params=cparams,
    )(p, x_dense)

    fused2 = fused.reshape(6, B_pad)   # contiguous reshape: free

    if not unpack:
        # Feature-major view; consumers avoid the transposes entirely.
        return fused2, fused2[5:6, :B]

    # PyTorch-compatible (B, F) unpack.  These slices + .T are wrapper-side XLA
    # transposes; use unpack=False (or return_activations=False) to skip them.
    h1 = fused2[0:3, :B].T             # (B, 3)
    h2 = fused2[3:5, :B].T             # (B, 2)
    y = fused2[5:6, :B].T              # (B, 1)
    x_array = [x, h1, h2, y]
    return x_array, y


def init_params(key):
    """Deterministic parameter init (PyTorch-Linear-style uniform bounds)."""
    params = {}
    keys = jax.random.split(key, 6)
    shapes = list(zip(LAYERS[:-1], LAYERS[1:]))  # [(1,3), (3,2), (2,1)]
    for i, (fan_in, fan_out) in enumerate(shapes):
        bound = 1.0 / (fan_in ** 0.5)
        params[f"w{i+1}"] = jax.random.uniform(
            keys[2 * i], (fan_in, fan_out), jnp.float32, -bound, bound)
        params[f"b{i+1}"] = jax.random.uniform(
            keys[2 * i + 1], (1, fan_out), jnp.float32, -bound, bound)
    return params


def _reference_forward(x, params):
    # Pure-JAX reference mirroring the PyTorch loop.
    h = x
    xs = [x]
    for i in range(3):
        h = jnp.dot(h, params[f"w{i+1}"]) + params[f"b{i+1}"]
        if i < 2:
            h = jnp.tanh(h)
        xs.append(h)
    return xs, h


if __name__ == "__main__":
    key = jax.random.PRNGKey(0)
    pkey, xkey = jax.random.split(key)
    params = init_params(pkey)

    # Small batch (single tile) and a multi-tile batch exercising the 2-step grid.
    for B in (8, 3000):
        x = jax.random.normal(jax.random.fold_in(xkey, B), (B, LAYERS[0]),
                              dtype=jnp.float32)

        x_array, y = my_ann_forward(x, params)
        y = jax.block_until_ready(y)
        x_array = [jax.block_until_ready(a) for a in x_array]

        ref_array, ref_y = _reference_forward(x, params)
        for a, b in zip(x_array, ref_array):
            assert a.shape == b.shape, (a.shape, b.shape)
            assert jnp.allclose(a, b, atol=5e-5), "activation mismatch vs reference"
        assert jnp.allclose(y, ref_y, atol=5e-5), "output mismatch vs reference"

        # y-only fast path
        y_fast = jax.block_until_ready(
            my_ann_forward(x, params, return_activations=False))
        assert y_fast.shape == ref_y.shape
        assert jnp.allclose(y_fast, ref_y, atol=5e-5), "fast-path mismatch"

        # fused feature-major path (no wrapper transposes)
        fused, y_row = my_ann_forward(x, params, unpack=False)
        fused = jax.block_until_ready(fused)
        assert jnp.allclose(y_row, ref_y.T, atol=5e-5), "fused-path mismatch"

    print("KERNEL_OK")
</pallas_src>

<mosaic_0001>
module attributes {stable_mosaic.version = 11 : i64} {
  func.func @_mlp_full_kernel(%arg0: i32, %arg1: memref<17xf32, #tpu.memory_space<smem>>, %arg2: memref<8x128xf32, #tpu.memory_space<vmem>>, %arg3: memref<6x8x128xf32, #tpu.memory_space<vmem>>) attributes {dimension_semantics = [#tpu.dimension_semantics<parallel>], iteration_bounds = array<i64: 1>, scalar_prefetch = 0 : i64, scratch_operands = 0 : i64, tpu.core_type = #tpu.core_type<tc>, window_params = [{transform_indices = @transform_0, window_bounds = array<i64: 17>}, {transform_indices = @transform_1, window_bounds = array<i64: 8, 128>}, {transform_indices = @transform_2, window_bounds = array<i64: 6, 8, 128>}]} {
    %c0 = arith.constant 0 : index
    %c0_0 = arith.constant 0 : index
    %0 = vector.load %arg2[%c0, %c0_0] : memref<8x128xf32, #tpu.memory_space<vmem>>, vector<8x128xf32>
    %c0_1 = arith.constant 0 : index
    %1 = memref.load %arg1[%c0_1] : memref<17xf32, #tpu.memory_space<smem>>
    %2 = vector.broadcast %1 : f32 to vector<8x128xf32>
    %3 = arith.mulf %2, %0 : vector<8x128xf32>
    %c3 = arith.constant 3 : index
    %4 = memref.load %arg1[%c3] : memref<17xf32, #tpu.memory_space<smem>>
    %5 = vector.broadcast %4 : f32 to vector<8x128xf32>
    %6 = arith.addf %3, %5 : vector<8x128xf32>
    %7 = math.tanh %6 : vector<8x128xf32>
    %c1 = arith.constant 1 : index
    %8 = memref.load %arg1[%c1] : memref<17xf32, #tpu.memory_space<smem>>
    %9 = vector.broadcast %8 : f32 to vector<8x128xf32>
    %10 = arith.mulf %9, %0 : vector<8x128xf32>
    %c4 = arith.constant 4 : index
    %11 = memref.load %arg1[%c4] : memref<17xf32, #tpu.memory_space<smem>>
    %12 = vector.broadcast %11 : f32 to vector<8x128xf32>
    %13 = arith.addf %10, %12 : vector<8x128xf32>
    %14 = math.tanh %13 : vector<8x128xf32>
    %c2 = arith.constant 2 : index
    %15 = memref.load %arg1[%c2] : memref<17xf32, #tpu.memory_space<smem>>
    %16 = vector.broadcast %15 : f32 to vector<8x128xf32>
    %17 = arith.mulf %16, %0 : vector<8x128xf32>
    %c5 = arith.constant 5 : index
    %18 = memref.load %arg1[%c5] : memref<17xf32, #tpu.memory_space<smem>>
    %19 = vector.broadcast %18 : f32 to vector<8x128xf32>
    %20 = arith.addf %17, %19 : vector<8x128xf32>
    %21 = math.tanh %20 : vector<8x128xf32>
    %c6 = arith.constant 6 : index
    %22 = memref.load %arg1[%c6] : memref<17xf32, #tpu.memory_space<smem>>
    %23 = vector.broadcast %22 : f32 to vector<8x128xf32>
    %24 = arith.mulf %7, %23 : vector<8x128xf32>
    %c8 = arith.constant 8 : index
    %25 = memref.load %arg1[%c8] : memref<17xf32, #tpu.memory_space<smem>>
    %26 = vector.broadcast %25 : f32 to vector<8x128xf32>
    %27 = arith.mulf %14, %26 : vector<8x128xf32>
    %28 = arith.addf %24, %27 : vector<8x128xf32>
    %c10 = arith.constant 10 : index
    %29 = memref.load %arg1[%c10] : memref<17xf32, #tpu.memory_space<smem>>
    %30 = vector.broadcast %29 : f32 to vector<8x128xf32>
    %31 = arith.mulf %21, %30 : vector<8x128xf32>
    %32 = arith.addf %28, %31 : vector<8x128xf32>
    %c12 = arith.constant 12 : index
    %33 = memref.load %arg1[%c12] : memref<17xf32, #tpu.memory_space<smem>>
    %34 = vector.broadcast %33 : f32 to vector<8x128xf32>
    %35 = arith.addf %32, %34 : vector<8x128xf32>
    %36 = math.tanh %35 : vector<8x128xf32>
    %c7 = arith.constant 7 : index
    %37 = memref.load %arg1[%c7] : memref<17xf32, #tpu.memory_space<smem>>
    %38 = vector.broadcast %37 : f32 to vector<8x128xf32>
    %39 = arith.mulf %7, %38 : vector<8x128xf32>
    %c9 = arith.constant 9 : index
    %40 = memref.load %arg1[%c9] : memref<17xf32, #tpu.memory_space<smem>>
    %41 = vector.broadcast %40 : f32 to vector<8x128xf32>
    %42 = arith.mulf %14, %41 : vector<8x128xf32>
    %43 = arith.addf %39, %42 : vector<8x128xf32>
    %c11 = arith.constant 11 : index
    %44 = memref.load %arg1[%c11] : memref<17xf32, #tpu.memory_space<smem>>
    %45 = vector.broadcast %44 : f32 to vector<8x128xf32>
    %46 = arith.mulf %21, %45 : vector<8x128xf32>
    %47 = arith.addf %43, %46 : vector<8x128xf32>
    %c13 = arith.constant 13 : index
    %48 = memref.load %arg1[%c13] : memref<17xf32, #tpu.memory_space<smem>>
    %49 = vector.broadcast %48 : f32 to vector<8x128xf32>
    %50 = arith.addf %47, %49 : vector<8x128xf32>
    %51 = math.tanh %50 : vector<8x128xf32>
    %c14 = arith.constant 14 : index
    %52 = memref.load %arg1[%c14] : memref<17xf32, #tpu.memory_space<smem>>
    %53 = vector.broadcast %52 : f32 to vector<8x128xf32>
    %54 = arith.mulf %36, %53 : vector<8x128xf32>
    %c15 = arith.constant 15 : index
    %55 = memref.load %arg1[%c15] : memref<17xf32, #tpu.memory_space<smem>>
    %56 = vector.broadcast %55 : f32 to vector<8x128xf32>
    %57 = arith.mulf %51, %56 : vector<8x128xf32>
    %58 = arith.addf %54, %57 : vector<8x128xf32>
    %c16 = arith.constant 16 : index
    %59 = memref.load %arg1[%c16] : memref<17xf32, #tpu.memory_space<smem>>
    %60 = vector.broadcast %59 : f32 to vector<8x128xf32>
    %61 = arith.addf %58, %60 : vector<8x128xf32>
    %c0_2 = arith.constant 0 : index
    %c0_3 = arith.constant 0 : index
    %c0_4 = arith.constant 0 : index
    %62 = vector.load %arg3[%c0_2, %c0_3, %c0_4] : memref<6x8x128xf32, #tpu.memory_space<vmem>>, vector<1x8x128xf32>
    %63 = vector.shape_cast %62 : vector<1x8x128xf32> to vector<8x128xf32>
    %64 = vector.shape_cast %7 : vector<8x128xf32> to vector<1x8x128xf32>
    tpu.vector_store %arg3[%c0_2, %c0_3, %c0_4], %64 {strides = array<i32>} : memref<6x8x128xf32, #tpu.memory_space<vmem>>, vector<1x8x128xf32>,
    %c1_5 = arith.constant 1 : index
    %c0_6 = arith.constant 0 : index
    %c0_7 = arith.constant 0 : index
    %65 = vector.load %arg3[%c1_5, %c0_6, %c0_7] : memref<6x8x128xf32, #tpu.memory_space<vmem>>, vector<1x8x128xf32>
    %66 = vector.shape_cast %65 : vector<1x8x128xf32> to vector<8x128xf32>
    %67 = vector.shape_cast %14 : vector<8x128xf32> to vector<1x8x128xf32>
    tpu.vector_store %arg3[%c1_5, %c0_6, %c0_7], %67 {strides = array<i32>} : memref<6x8x128xf32, #tpu.memory_space<vmem>>, vector<1x8x128xf32>,
    %c2_8 = arith.constant 2 : index
    %c0_9 = arith.constant 0 : index
    %c0_10 = arith.constant 0 : index
    %68 = vector.load %arg3[%c2_8, %c0_9, %c0_10] : memref<6x8x128xf32, #tpu.memory_space<vmem>>, vector<1x8x128xf32>
    %69 = vector.shape_cast %68 : vector<1x8x128xf32> to vector<8x128xf32>
    %70 = vector.shape_cast %21 : vector<8x128xf32> to vector<1x8x128xf32>
    tpu.vector_store %arg3[%c2_8, %c0_9, %c0_10], %70 {strides = array<i32>} : memref<6x8x128xf32, #tpu.memory_space<vmem>>, vector<1x8x128xf32>,
    %c3_11 = arith.constant 3 : index
    %c0_12 = arith.constant 0 : index
    %c0_13 = arith.constant 0 : index
    %71 = vector.load %arg3[%c3_11, %c0_12, %c0_13] : memref<6x8x128xf32, #tpu.memory_space<vmem>>, vector<1x8x128xf32>
    %72 = vector.shape_cast %71 : vector<1x8x128xf32> to vector<8x128xf32>
    %73 = vector.shape_cast %36 : vector<8x128xf32> to vector<1x8x128xf32>
    tpu.vector_store %arg3[%c3_11, %c0_12, %c0_13], %73 {strides = array<i32>} : memref<6x8x128xf32, #tpu.memory_space<vmem>>, vector<1x8x128xf32>,
    %c4_14 = arith.constant 4 : index
    %c0_15 = arith.constant 0 : index
    %c0_16 = arith.constant 0 : index
    %74 = vector.load %arg3[%c4_14, %c0_15, %c0_16] : memref<6x8x128xf32, #tpu.memory_space<vmem>>, vector<1x8x128xf32>
    %75 = vector.shape_cast %74 : vector<1x8x128xf32> to vector<8x128xf32>
    %76 = vector.shape_cast %51 : vector<8x128xf32> to vector<1x8x128xf32>
    tpu.vector_store %arg3[%c4_14, %c0_15, %c0_16], %76 {strides = array<i32>} : memref<6x8x128xf32, #tpu.memory_space<vmem>>, vector<1x8x128xf32>,
    %c5_17 = arith.constant 5 : index
    %c0_18 = arith.constant 0 : index
    %c0_19 = arith.constant 0 : index
    %77 = vector.load %arg3[%c5_17, %c0_18, %c0_19] : memref<6x8x128xf32, #tpu.memory_space<vmem>>, vector<1x8x128xf32>
    %78 = vector.shape_cast %77 : vector<1x8x128xf32> to vector<8x128xf32>
    %79 = vector.shape_cast %61 : vector<8x128xf32> to vector<1x8x128xf32>
    tpu.vector_store %arg3[%c5_17, %c0_18, %c0_19], %79 {strides = array<i32>} : memref<6x8x128xf32, #tpu.memory_space<vmem>>, vector<1x8x128xf32>,
    return
  }
  func.func @transform_0(%arg0: i32) -> i32 {
    %c0_i32 = arith.constant 0 : i32
    %c0_i32_0 = arith.constant 0 : i32
    return %c0_i32 : i32
  }
  func.func @transform_1(%arg0: i32) -> (i32, i32) {
    %c0_i32 = arith.constant 0 : i32
    %c0_i32_0 = arith.constant 0 : i32
    return %c0_i32, %arg0 : i32, i32
  }
  func.func @transform_2(%arg0: i32) -> (i32, i32, i32) {
    %c0_i32 = arith.constant 0 : i32
    %c0_i32_0 = arith.constant 0 : i32
    %c0_i32_1 = arith.constant 0 : i32
    return %c0_i32, %c0_i32_0, %arg0 : i32, i32, i32
  }
}

</mosaic_0001>

<bundles_post_ra>
// kernel: tpu_custom_call.1
= control target key start
LH: loop header
LB: loop body
LE: loop exit
PB: predicated region body
PF: predicated region fallthrough
CT: control target
= control target key end

     0   :  { %7 = vsyncpa [#allocation5], 0  ;;  %s240_s0 = inlined_call_operand.hbm [shape: f32[17], index: 0, kind: input, shape index: {}]   ;;  %s241_s1 = inlined_call_operand.hbm [shape: f32[8,128], index: 1, kind: input, shape index: {}]   ;;  %s242_s2 = inlined_call_operand.hbm [shape: f32[6,8,128], index: 2, kind: output, shape index: {}]  }
   0x1   :  { %8 = vsyncpa [#allocation3], 0 }
   0x2   :  { %9 = vsyncpa [#allocation4], 0  ;;  %s211_s9 = smov [#allocation2]   ;;  %s212_s12 = smov [#allocation6]  }
   0x3   :  { %17 = dma.hbm_to_smem %s240_s0, 16, %s211_s9, [#allocation5]  }
   0x4   :  { %s24_s13 = sshll.u32 %s212_s12, 4  ;;  %s25_s13 = int_to_ptr.vmem [resolvable:$true] %s24_s13 }
   0x5   :  { %s173_s14 = scalar_lea.vmem %s25_s13, 128  ;;  %p178_p1 = scmp.lt.s32.totalorder %s25_s13, %s25_s13 }
   0x6   :  { %p174_p0 = scmp.ne.s32.totalorder %s25_s13, %s173_s14  ;;  %p179_p2 = scmp.lt.s32.totalorder %s173_s14, %s173_s14 }
   0x8   :  { %p180_p3 = por %p179_p2, %p178_p1 }
   0xa   :  { %p181_p4 = pnand %p180_p3, %p174_p0 }
   0xc   :  { %184 = shalt.err (!%p181_p4)
}
   0xd   :  { %27 = dma.hbm_to_vmem [thread:$0]  %s241_s1, 128, %s25_s13, [#allocation3]  }
   0xe   :  { %205 = dma.done.wait [#allocation5], 16  }
   0xf   :  { %206 = vsyncadd [#allocation5], 4294967280 }
  0x10   :  { %207 = dma.done.wait [#allocation3], 128  }
  0x11   :  { %208 = vsyncadd [#allocation3], 4294967168 }
  0x12   :  { %34 = sfence }
  0x13   :  { %s36_s0 = sld [smem:[#allocation2]]  ;;  %v35_v0 = vld [vmem:[#allocation6] sm:$0xff]  ;;  %s213_s4 = smov [#allocation7]  }
  0x14   :  { %s126_s17 = sld [smem:[#allocation2 + $0x3]]  ;;  %s113_s5 = sshll.u32 %s213_s4, 4  ;;  %s114_s5 = int_to_ptr.vmem [resolvable:$true] %s113_s5 }
  0x15   :  { %s127_s18 = sld [smem:[#allocation2 + $0x1]]  ;;  %s185_s6 = scalar_lea.vmem %s114_s5, 768 }
  0x16   :  { %s128_s19 = sld [smem:[#allocation2 + $0x4]]  ;;  %p186_p5 = scmp.ne.s32.totalorder %s114_s5, %s185_s6 }
  0x17   :  { %s129_s20 = sld [smem:[#allocation2 + $0x2]]  ;;  %p190_p6 = scmp.lt.s32.totalorder %s114_s5, %s114_s5 }
  0x18   :  { %s130_s21 = sld [smem:[#allocation2 + $0x5]]  ;;  %p191_p7 = scmp.lt.s32.totalorder %s185_s6, %s185_s6 }
  0x19   :  { %v37_v1 = vstv %s36_s0  ;;  %s131_s1 = sld [smem:[#allocation2 + $0x6]] }
  0x1a   :  { %v38_v2 = vmul.f32 %v37_v1, %v35_v0  ;;  %v40_v3 = vstv %s126_s17  ;;  %s135_s22 = sld [smem:[#allocation2 + $0x7]]  ;;  %p192_p8 = por %p191_p7, %p190_p6 }
  0x1b   :  { %v44_v4 = vstv %s127_s18  ;;  %s132_s23 = sld [smem:[#allocation2 + $0x8]] }
  0x1c   :  { %v41_v5 = vadd.f32 %v40_v3, %v38_v2  ;;  %v45_v6 = vmul.f32 %v44_v4, %v35_v0  ;;  %v47_v7 = vstv %s128_s19  ;;  %s136_s24 = sld [smem:[#allocation2 + $0x9]]  ;;  %p193_p9 = pnand %p192_p8, %p186_p5 }
  0x1d   :  { %v51_v8 = vstv %s129_s20  ;;  %s133_s25 = sld [smem:[#allocation2 + $0xa]] }
  0x1e   :  { %147 = vtanh.f32 %v41_v5  ;;  %v48_v9 = vadd.f32 %v47_v7, %v45_v6  ;;  %v52_v10 = vmul.f32 %v51_v8, %v35_v0  ;;  %v54_v11 = vstv %s130_s21  ;;  %s137_s26 = sld [smem:[#allocation2 + $0xb]] }
  0x1f   :  { %s134_s27 = sld [smem:[#allocation2 + $0xc]]  ;;  %v58_v13 = vstv %s131_s1 }
  0x20   :  { %149 = vtanh.f32 %v48_v9  ;;  %v55_v12 = vadd.f32 %v54_v11, %v52_v10  ;;  %v73_v14 = vstv %s135_s22  ;;  %s138_s28 = sld [smem:[#allocation2 + $0xd]] }
  0x21   :  { %v61_v16 = vstv %s132_s23  ;;  %s139_s29 = sld [smem:[#allocation2 + $0xe]] }
  0x22   :  { %151 = vtanh.f32 %v55_v12  ;;  %v76_v17 = vstv %s136_s24  ;;  %s140_s30 = sld [smem:[#allocation2 + $0xf]] }
  0x23   :  { %v65_v21 = vstv %s133_s25  ;;  %s141_s3 = sld [smem:[#allocation2 + $0x10]] }
  0x24   :  { %v80_v22 = vstv %s137_s26 }
  0x25   :  { %v69_v30 = vstv %s134_s27 }
  0x26   :  { %v84_v31 = vstv %s138_s28 }
  0x27   :  { %v88_v36 = vstv %s139_s29 }
  0x28   :  { %v91_v37 = vstv %s140_s30 }
  0x29   :  { %v95_v42 = vstv %s141_s3 }
  0x2b   :  { %v148_v15 = vpop.eup %147 }
  0x2c   :  { %97 = vst [vmem:[#allocation7] sm:$0xff] %v148_v15  ;;  %v59_v18 = vmul.f32 %v148_v15, %v58_v13  ;;  %v74_v19 = vmul.f32 %v148_v15, %v73_v14 }
  0x2d   :  { %v150_v20 = vpop.eup %149 }
  0x2e   :  { %99 = vst [vmem:[#allocation7 + $0x8] sm:$0xff] %v150_v20  ;;  %v62_v23 = vmul.f32 %v150_v20, %v61_v16  ;;  %v77_v24 = vmul.f32 %v150_v20, %v76_v17 }
  0x2f   :  { %v152_v25 = vpop.eup %151 }
  0x30   :  { %101 = vst [vmem:[#allocation7 + $0x10] sm:$0xff] %v152_v25  ;;  %v63_v26 = vadd.f32 %v62_v23, %v59_v18  ;;  %v66_v27 = vmul.f32 %v152_v25, %v65_v21  ;;  %v78_v28 = vadd.f32 %v77_v24, %v74_v19  ;;  %v81_v29 = vmul.f32 %v152_v25, %v80_v22 }
  0x32   :  { %v67_v32 = vadd.f32 %v66_v27, %v63_v26  ;;  %v82_v33 = vadd.f32 %v81_v29, %v78_v28 }
  0x34   :  { %v70_v34 = vadd.f32 %v69_v30, %v67_v32  ;;  %v85_v35 = vadd.f32 %v84_v31, %v82_v33 }
  0x36   :  { %153 = vtanh.f32 %v70_v34 }
  0x37   :  { %155 = vtanh.f32 %v85_v35 }
  0x43   :  { %v154_v38 = vpop.eup %153 }
  0x44   :  { %v156_v39 = vpop.eup %155  ;;  %103 = vst [vmem:[#allocation7 + $0x18] sm:$0xff] %v154_v38  ;;  %v89_v40 = vmul.f32 %v154_v38, %v88_v36 }
  0x45   :  { %105 = vst [vmem:[#allocation7 + $0x20] sm:$0xff] %v156_v39  ;;  %v92_v41 = vmul.f32 %v156_v39, %v91_v37 }
  0x47   :  { %v93_v43 = vadd.f32 %v92_v41, %v89_v40 }
  0x49   :  { %v96_v44 = vadd.f32 %v95_v42, %v93_v43 }
  0x4b   :  { %107 = vst [vmem:[#allocation7 + $0x28] sm:$0xff] %v96_v44 }
  0x4c   :  { %196 = shalt.err (!%p193_p9)
}
  0x4d   :  { %s214_s7 = smov 128   ;;  %s215_s8 = smov 8  }
  0x4e   :  { %119 = dma.vmem_to_hbm [thread:$0]  %s114_s5, 768, %s242_s2, [#allocation4], %s214_s7, %s214_s7, %s215_s8  }
  0x4f   :  { %209 = dma.done.wait [#allocation4], 768  }
  0x50   :  { %210 = vsyncadd [#allocation4], 4294966528 }
  0x51   :  { %123 = vsyncpa [#allocation3], 1 }
  0x52   :  { %124 = vsyncpa [#allocation4], 1 }
  0x53   :  { %125 = vsyncpa [#allocation5], 1 }

</bundles_post_ra>
